<compile_context>
chip_gen: v5e
topology: v5e:2x2
jax: 0.10.0
libtpu: 0.0.40
codegen_flags: <defaults>
</compile_context>

<pallas_src>
import jax
import jax.numpy as jnp
from jax.experimental import pallas as pl
from jax.experimental.pallas import tpu as pltpu


# ----------------------------- single instance -----------------------------

def net_kernel(p1_ref, x_ref, wt_ref, b_ref, o_ref):
    # h = param1 @ input
    h = jnp.dot(p1_ref[...], x_ref[...], preferred_element_type=jnp.float32)
    # out = h @ W^T + b ; W^T was materialized in the wrapper -> plain dot.
    y = jnp.dot(h, wt_ref[...], preferred_element_type=jnp.float32)
    o_ref[...] = y + b_ref[...]          # (1,4) bias broadcasts over rows


def net_forward(param1, x, w, b):
    """param1: (3,3) f32, x: (3,3) f32, w: (4,3) f32, b: (4,) f32 -> (3,4) f32."""
    wt = w.T                             # (3,4) wrapper-side, no in-kernel .T
    b2d = b.reshape(1, -1)               # (1,4)
    out_rows, out_cols = param1.shape[0], w.shape[0]
    vmem = pl.BlockSpec(memory_space=pltpu.MemorySpace.VMEM)
    return pl.pallas_call(
        net_kernel,
        out_shape=jax.ShapeDtypeStruct((out_rows, out_cols), jnp.float32),
        in_specs=[vmem, vmem, vmem, vmem],
        out_specs=vmem,
    )(param1, x, wt, b2d)


# ------------------------------ batched (B>1) ------------------------------

def net_batched_kernel(p1_ref, xw_ref, wblk_ref, bw_ref, o_ref):
    # One wide MXU dot: (3,3) @ (3, 3B) -> (3, 3B), lane-dense result.
    h_wide = jnp.dot(p1_ref[...], xw_ref[...], preferred_element_type=jnp.float32)
    # Second matmul as ONE wide dot against block-diag(W^T): (3,3B)@(3B,4B).
    y = jnp.dot(h_wide, wblk_ref[...], preferred_element_type=jnp.float32)
    o_ref[...] = y + bw_ref[...]         # (1, 4B) bias row broadcasts over rows


def net_forward_batched(param1, x_batch, w, b):
    """x_batch: (B,3,3) -> (B,3,4). All B samples in a single pallas_call."""
    B = x_batch.shape[0]
    k_in, k_out = param1.shape[1], w.shape[0]          # 3, 4
    # Lane-stack the inputs: (B,3,3) -> (3, 3B)   (wrapper-side plumbing).
    x_wide = jnp.transpose(x_batch, (1, 0, 2)).reshape(k_in, k_in * B)
    # Block-diagonal W^T: (3B, 4B) so the per-sample Linear is one wide dot.
    wt = w.T                                           # (3,4)
    eye = jnp.eye(B, dtype=w.dtype)
    w_blk = jnp.einsum("bc,kl->bkcl", eye, wt).reshape(k_in * B, k_out * B)
    b_wide = jnp.tile(b.reshape(1, -1), (1, B))        # (1, 4B)

    vmem = pl.BlockSpec(memory_space=pltpu.MemorySpace.VMEM)
    out_wide = pl.pallas_call(
        net_batched_kernel,
        out_shape=jax.ShapeDtypeStruct((k_in, k_out * B), jnp.float32),
        in_specs=[vmem, vmem, vmem, vmem],
        out_specs=vmem,
    )(param1, x_wide, w_blk, b_wide)
    # (3, 4B) -> (B, 3, 4)
    return jnp.transpose(out_wide.reshape(k_in, B, k_out), (1, 0, 2))


# --------------------------------- params ----------------------------------

def init_params(key):
    """Deterministic synthetic init matching the PyTorch shapes."""
    k1, k2, k3 = jax.random.split(key, 3)
    # nn.Parameter(torch.rand(3, 3)) -> uniform [0, 1)
    param1 = jax.random.uniform(k1, (3, 3), dtype=jnp.float32)
    # nn.Linear(3, 4): weight (4,3), bias (4,), uniform(-1/sqrt(3), 1/sqrt(3))
    bound = 1.0 / jnp.sqrt(3.0)
    w = jax.random.uniform(k2, (4, 3), dtype=jnp.float32,
                           minval=-bound, maxval=bound)
    b = jax.random.uniform(k3, (4,), dtype=jnp.float32,
                           minval=-bound, maxval=bound)
    return param1, w, b


if __name__ == "__main__":
    key = jax.random.PRNGKey(0)
    kp, kx, kxb = jax.random.split(key, 3)
    param1, w, b = init_params(kp)

    # Single-instance forward (matches the module's shapes exactly).
    x = jax.random.uniform(kx, (3, 3), dtype=jnp.float32)
    out = jax.block_until_ready(net_forward(param1, x, w, b))
    ref = (param1 @ x) @ w.T + b
    assert out.shape == (3, 4)
    assert jnp.allclose(out, ref, atol=1e-4, rtol=1e-4)

    # Batched forward: B instances amortized into one lane-dense kernel call.
    B = 32                                  # 4*B = 128 -> lane-dense output
    xb = jax.random.uniform(kxb, (B, 3, 3), dtype=jnp.float32)
    outb = jax.block_until_ready(net_forward_batched(param1, xb, w, b))
    refb = jax.vmap(lambda xi: (param1 @ xi) @ w.T + b)(xb)
    assert outb.shape == (B, 3, 4)
    assert jnp.allclose(outb, refb, atol=1e-4, rtol=1e-4)

    # TODO(synk): MyModule.forward() is literally `pass`; the Conv2d(3,3,3) in
    # module_list is never invoked by the forward, so it is not implemented.
    print("KERNEL_OK")
</pallas_src>

<mosaic_0001>
module attributes {stable_mosaic.version = 11 : i64} {
  func.func @net_kernel(%arg0: memref<3x3xf32, #tpu.memory_space<vmem>>, %arg1: memref<3x3xf32, #tpu.memory_space<vmem>>, %arg2: memref<3x4xf32, #tpu.memory_space<vmem>>, %arg3: memref<1x4xf32, #tpu.memory_space<vmem>>, %arg4: memref<3x4xf32, #tpu.memory_space<vmem>>) attributes {dimension_semantics = [], scalar_prefetch = 0 : i64, scratch_operands = 0 : i64, tpu.core_type = #tpu.core_type<tc>} {
    %c0 = arith.constant 0 : index
    %c0_0 = arith.constant 0 : index
    %0 = vector.load %arg0[%c0, %c0_0] : memref<3x3xf32, #tpu.memory_space<vmem>>, vector<3x3xf32>
    %c0_1 = arith.constant 0 : index
    %c0_2 = arith.constant 0 : index
    %1 = vector.load %arg1[%c0_1, %c0_2] : memref<3x3xf32, #tpu.memory_space<vmem>>, vector<3x3xf32>
    %cst = arith.constant dense<0.000000e+00> : vector<3x3xf32>
    %2 = tpu.matmul %0, %1, %cst {dimension_numbers = #tpu.dot_dimension_numbers<[1], [0], [0], [1], [0, 0, 1, 1], [], []>} : vector<3x3xf32>, vector<3x3xf32>, vector<3x3xf32> -> vector<3x3xf32>
    %c0_3 = arith.constant 0 : index
    %c0_4 = arith.constant 0 : index
    %3 = vector.load %arg2[%c0_3, %c0_4] : memref<3x4xf32, #tpu.memory_space<vmem>>, vector<3x4xf32>
    %cst_5 = arith.constant dense<0.000000e+00> : vector<3x4xf32>
    %4 = tpu.matmul %2, %3, %cst_5 {dimension_numbers = #tpu.dot_dimension_numbers<[1], [0], [0], [1], [0, 0, 1, 1], [], []>} : vector<3x3xf32>, vector<3x4xf32>, vector<3x4xf32> -> vector<3x4xf32>
    %c0_6 = arith.constant 0 : index
    %c0_7 = arith.constant 0 : index
    %5 = vector.load %arg3[%c0_6, %c0_7] : memref<1x4xf32, #tpu.memory_space<vmem>>, vector<1x4xf32>
    %6 = vector.broadcast %5 : vector<1x4xf32> to vector<3x4xf32>
    %7 = arith.addf %4, %6 : vector<3x4xf32>
    %c0_8 = arith.constant 0 : index
    %c0_9 = arith.constant 0 : index
    %8 = vector.load %arg4[%c0_8, %c0_9] : memref<3x4xf32, #tpu.memory_space<vmem>>, vector<3x4xf32>
    tpu.vector_store %arg4[%c0_8, %c0_9], %7 {strides = array<i32>} : memref<3x4xf32, #tpu.memory_space<vmem>>, vector<3x4xf32>,
    return
  }
}

</mosaic_0001>

<bundles_post_ra>
// kernel: tpu_custom_call.1
= control target key start
LH: loop header
LB: loop body
LE: loop exit
PB: predicated region body
PF: predicated region fallthrough
CT: control target
= control target key end

     0   :  { %9 = vsyncpa [#allocation3], 0  ;;  %s295_s0 = inlined_call_operand.hbm [shape: f32[3,3], index: 0, kind: input, shape index: {}]   ;;  %s296_s1 = inlined_call_operand.hbm [shape: f32[3,3], index: 1, kind: input, shape index: {}]   ;;  %s297_s2 = inlined_call_operand.hbm [shape: f32[3,4], index: 2, kind: input, shape index: {}]   ;;  %s298_s3 = inlined_call_operand.vmem [shape: f32[1,4], index: 3, kind: input, shape index: {}]   ;;  %s299_s4 = inlined_call_operand.hbm [shape: f32[3,4], index: 4, kind: output, shape index: {}]  }
   0x1   :  { %10 = vsyncpa [#allocation6], 0  ;;  %s28_s17 = sshll.u32 %s296_s1, 4  ;;  %s29_s17 = int_to_ptr.hbm [resolvable:$true] %s28_s17 }
   0x2   :  { %11 = vsyncpa [#allocation4], 0  ;;  %s251_s18 = smov [#allocation5]   ;;  %s17_s22 = sshll.u32 %s295_s0, 4  ;;  %s18_s22 = int_to_ptr.hbm [resolvable:$true] %s17_s22 }
   0x3   :  { %s30_s19 = sshll.u32 %s251_s18, 4  ;;  %s252_s23 = smov [#allocation2]   ;;  %s31_s19 = int_to_ptr.vmem [resolvable:$true] %s30_s19 }
   0x4   :  { %33 = dma.hbm_to_vmem [thread:$0]  %s29_s17, 64, %s31_s19, [#allocation6]  }
   0x5   :  { %s19_s24 = sshll.u32 %s252_s23, 4  ;;  %s39_s27 = sshll.u32 %s297_s2, 4  ;;  %s20_s24 = int_to_ptr.vmem [resolvable:$true] %s19_s24  ;;  %s40_s27 = int_to_ptr.hbm [resolvable:$true] %s39_s27 }
   0x6   :  { %22 = dma.hbm_to_vmem [thread:$0]  %s18_s22, 64, %s20_s24, [#allocation3]  }
   0x7   :  { %s253_s1 = smov [#allocation7]  }
   0x8   :  { %s41_s28 = sshll.u32 %s253_s1, 4  ;;  %s42_s28 = int_to_ptr.vmem [resolvable:$true] %s41_s28 }
   0x9   :  { %44 = dma.hbm_to_vmem [thread:$0]  %s40_s27, 64, %s42_s28, [#allocation6]  }
   0xa   :  { %245 = dma.done.wait [#allocation3], 64  }
   0xb   :  { %246 = vsyncadd [#allocation3], 4294967232 }
   0xc   :  { %247 = dma.done.wait [#allocation6], 128  }
   0xd   :  { %248 = vsyncadd [#allocation6], 4294967168  ;;  %vm65_vm0 = vcmask 1042432   ;;  %vm61_vm1 = vcmask 23552   ;;  %v60_v0 = vld [vmem:[#allocation5] sm:$0x7] }
   0xe   :  { %v59_v1 = vld [vmem:[#allocation2] sm:$0x7]  ;;  %140 = vmatpush.msk.msra.mxu0 %vm65_vm0, %v60_v0  ;;  %v89_v2 = vld [vmem:[#allocation7] sm:$0x7]  ;;  %s254_s29 = smov [#allocation8]   ;;  %s129_s7 = sshll.u32 %s299_s4, 4  ;;  %s130_s7 = int_to_ptr.hbm [resolvable:$true] %s129_s7 }
   0xf   :  { %141 = vmatmul.msk.f32.vlgmr.msra.gmra.mxu0 %vm61_vm1, %v59_v1  ;;  %142 = vmatpush.msk.msra.mxu1 %vm65_vm0, %v89_v2  ;;  %v148_v4 = vld [vmem:[%s298_s3] ss:$0 sm:$0xff]  ;;  %s127_s30 = sshll.u32 %s254_s29, 4  ;;  %vm120_vm2 = vcmask 26624   ;;  %s128_s30 = int_to_ptr.vmem [resolvable:$true] %s127_s30 }
  0x8c   :  { %v86_v3 = vpop.f32.mrf.mxu0 }
  0x8d   :  { %143 = vmatmul.msk.f32.vlgmr.msra.gmra.mxu1 %vm61_vm1, %v86_v3 }
 0x10a   :  { %v117_v5 = vpop.f32.mrf.mxu1 }
 0x10b   :  { %v118_v6 = vadd.f32 %v148_v4, %v117_v5 }
 0x10d   :  { %121 = vst.msk [vmem:[#allocation8] sm:$0x7] %vm120_vm2, %v118_v6 }
 0x10e   :  { %132 = dma.vmem_to_hbm [thread:$0]  %s128_s30, 64, %s130_s7, [#allocation4]  }
 0x10f   :  { %249 = dma.done.wait [#allocation4], 64  }
 0x110   :  { %250 = vsyncadd [#allocation4], 4294967232 }
 0x111   :  { %137 = vsyncpa [#allocation3], 1 }
 0x112   :  { %138 = vsyncpa [#allocation6], 1 }
 0x113   :  { %139 = vsyncpa [#allocation4], 1 }

</bundles_post_ra>
